<compile_context>
chip_gen: v5e
topology: v5e:2x2
jax: 0.10.0
libtpu: 0.0.40
codegen_flags: <defaults>
</compile_context>

<pallas_src>
import functools

import jax
import jax.numpy as jnp
from jax.experimental import pallas as pl
from jax.experimental.pallas import tpu as pltpu


_LANE = 128            # lane width: last block dim must be a multiple of this
_F_TILE_MAX = 512      # sublane tile cap (multiple of 8/16; bounds VMEM for big F)
_TARGET_BLOCK_BYTES = 4 << 20   # ~4 MiB blocks: at/near HBM roofline, few steps
_VMEM_LIMIT_BYTES = 32 << 20    # explicit scoped-VMEM budget (safe on v5e/v6e/v7x)


def _learnable_sigmoid_kernel(param_ref, x_ref, o_ref, *, beta):
    # param_ref: (tf, 1); x_ref / o_ref: (tf, tt).
    # beta * sigmoid(p*x) == 0.5*beta * tanh(0.5*p*x) + 0.5*beta  (exact identity)
    p = param_ref[...].astype(jnp.float32)
    x = x_ref[...].astype(jnp.float32)
    half_beta = 0.5 * float(beta)
    z = (0.5 * p) * x                      # (tf,1) scale folded before broadcast
    o_ref[...] = (half_beta * jnp.tanh(z) + half_beta).astype(o_ref.dtype)


def learnable_sigmoid_2d(x, param, beta=1.0):
    """beta * sigmoid(param * x).  x: (B, F, T), param: (F, 1)."""
    B, F, T = x.shape
    assert param.shape == (F, 1), param.shape
    itemsize = jnp.dtype(x.dtype).itemsize

    # Sublane (F) tile: full F when small, else a 512-row cap so block bytes
    # stay bounded and tt stays wide.  (512 % 8 == 0 -> always layout-legal.)
    tf = F if F <= _F_TILE_MAX else _F_TILE_MAX

    # Lane (T) tile: ~TARGET bytes per block, multiple of 128.  If the whole T
    # fits in the budget use the full (possibly ragged) extent -- a block dim
    # equal to the array dim is always legal.
    budget_tt = (_TARGET_BLOCK_BYTES // max(tf * itemsize, 1)) // _LANE * _LANE
    budget_tt = max(budget_tt, _LANE)
    tt = T if budget_tt >= T else budget_tt   # budget_tt < T  =>  tt % 128 == 0

    grid = (B, pl.cdiv(F, tf), pl.cdiv(T, tt))

    p_spec = pl.BlockSpec((tf, 1), lambda b, f, t: (f, 0))
    x_spec = pl.BlockSpec((pl.Squeezed(), tf, tt), lambda b, f, t: (b, f, t))
    dims = ("parallel", "parallel", "parallel")

    kernel = functools.partial(_learnable_sigmoid_kernel, beta=beta)
    return pl.pallas_call(
        kernel,
        out_shape=jax.ShapeDtypeStruct((B, F, T), x.dtype),
        grid_spec=pltpu.PrefetchScalarGridSpec(
            num_scalar_prefetch=0,
            grid=grid,
            in_specs=[p_spec, x_spec],
            out_specs=x_spec,
        ),
        compiler_params=pltpu.CompilerParams(
            dimension_semantics=dims,
            vmem_limit_bytes=_VMEM_LIMIT_BYTES,
        ),
    )(param, x)


if __name__ == "__main__":
    def ref_fn(x, param, beta):
        xf = x.astype(jnp.float32)
        pf = param.astype(jnp.float32)
        return (beta * jax.nn.sigmoid(pf * xf)).astype(x.dtype)

    key = jax.random.PRNGKey(0)
    k1, k2, k3, k4 = jax.random.split(key, 4)

    # --- Test 1: small demo shape, f32, beta=1 (param = ones, like nn.Parameter init). ---
    B, F, T = 2, 16, 128
    x = jax.random.normal(k1, (B, F, T), dtype=jnp.float32)
    param = jnp.ones((F, 1), dtype=jnp.float32)
    out = jax.block_until_ready(learnable_sigmoid_2d(x, param, beta=1.0))
    assert out.shape == (B, F, T) and out.dtype == x.dtype
    assert jnp.allclose(out, ref_fn(x, param, 1.0), atol=1e-4, rtol=1e-4)

    # --- Test 2: bf16 input, beta != 1. ---
    B2, F2, T2 = 2, 64, 1024
    x2 = jax.random.normal(k2, (B2, F2, T2), dtype=jnp.bfloat16)
    param2 = jnp.full((F2, 1), 0.5, dtype=jnp.bfloat16)
    out2 = jax.block_until_ready(learnable_sigmoid_2d(x2, param2, beta=2.0))
    ref2 = ref_fn(x2, param2, 2.0)
    assert out2.shape == (B2, F2, T2) and out2.dtype == x2.dtype
    assert jnp.allclose(out2.astype(jnp.float32), ref2.astype(jnp.float32),
                        atol=2e-2, rtol=2e-2)

    # --- Test 3: ragged F and T -> exercises F-tiling + tail masking on both axes. ---
    B3, F3, T3 = 1, 520, 2100
    x3 = jax.random.normal(k3, (B3, F3, T3), dtype=jnp.float32)
    param3 = (jax.random.normal(k4, (F3, 1), dtype=jnp.float32) * 0.1
              + jnp.ones((F3, 1), dtype=jnp.float32))
    out3 = jax.block_until_ready(learnable_sigmoid_2d(x3, param3, beta=0.7))
    assert out3.shape == (B3, F3, T3) and out3.dtype == x3.dtype
    assert jnp.allclose(out3, ref_fn(x3, param3, 0.7), atol=1e-4, rtol=1e-4)

    print("KERNEL_OK")
</pallas_src>

<mosaic_0001>
module attributes {stable_mosaic.version = 11 : i64} {
  func.func @_learnable_sigmoid_kernel(%arg0: i32, %arg1: i32, %arg2: i32, %arg3: memref<16x1xf32, #tpu.memory_space<vmem>>, %arg4: memref<1x16x128xf32, #tpu.memory_space<vmem>>, %arg5: memref<1x16x128xf32, #tpu.memory_space<vmem>>) attributes {dimension_semantics = [#tpu.dimension_semantics<parallel>, #tpu.dimension_semantics<parallel>, #tpu.dimension_semantics<parallel>], iteration_bounds = array<i64: 2, 1, 1>, scalar_prefetch = 0 : i64, scratch_operands = 0 : i64, tpu.core_type = #tpu.core_type<tc>, window_params = [{transform_indices = @transform_0, window_bounds = array<i64: 16, 1>}, {transform_indices = @transform_1, window_bounds = array<i64: 1, 16, 128>}, {transform_indices = @transform_2, window_bounds = array<i64: 1, 16, 128>}]} {
    %c0 = arith.constant 0 : index
    %c0_0 = arith.constant 0 : index
    %0 = vector.load %arg3[%c0, %c0_0] : memref<16x1xf32, #tpu.memory_space<vmem>>, vector<16x1xf32>
    %c0_1 = arith.constant 0 : index
    %c0_2 = arith.constant 0 : index
    %c0_3 = arith.constant 0 : index
    %1 = vector.load %arg4[%c0_1, %c0_2, %c0_3] : memref<1x16x128xf32, #tpu.memory_space<vmem>>, vector<1x16x128xf32>
    %2 = vector.shape_cast %1 : vector<1x16x128xf32> to vector<16x128xf32>
    %cst = arith.constant 5.000000e-01 : f32
    %3 = vector.broadcast %cst : f32 to vector<16x1xf32>
    %4 = arith.mulf %3, %0 : vector<16x1xf32>
    %5 = vector.broadcast %4 : vector<16x1xf32> to vector<16x128xf32>
    %6 = arith.mulf %5, %2 : vector<16x128xf32>
    %7 = math.tanh %6 : vector<16x128xf32>
    %cst_4 = arith.constant 5.000000e-01 : f32
    %8 = vector.broadcast %cst_4 : f32 to vector<16x128xf32>
    %9 = arith.mulf %8, %7 : vector<16x128xf32>
    %cst_5 = arith.constant 5.000000e-01 : f32
    %10 = vector.broadcast %cst_5 : f32 to vector<16x128xf32>
    %11 = arith.addf %9, %10 : vector<16x128xf32>
    %c0_6 = arith.constant 0 : index
    %c0_7 = arith.constant 0 : index
    %c0_8 = arith.constant 0 : index
    %12 = vector.load %arg5[%c0_6, %c0_7, %c0_8] : memref<1x16x128xf32, #tpu.memory_space<vmem>>, vector<1x16x128xf32>
    %13 = vector.shape_cast %12 : vector<1x16x128xf32> to vector<16x128xf32>
    %14 = vector.shape_cast %11 : vector<16x128xf32> to vector<1x16x128xf32>
    tpu.vector_store %arg5[%c0_6, %c0_7, %c0_8], %14 {strides = array<i32>} : memref<1x16x128xf32, #tpu.memory_space<vmem>>, vector<1x16x128xf32>,
    return
  }
  func.func @transform_0(%arg0: i32, %arg1: i32, %arg2: i32) -> (i32, i32) {
    %c0_i32 = arith.constant 0 : i32
    %c0_i32_0 = arith.constant 0 : i32
    return %arg1, %c0_i32 : i32, i32
  }
  func.func @transform_1(%arg0: i32, %arg1: i32, %arg2: i32) -> (i32, i32, i32) {
    %c0_i32 = arith.constant 0 : i32
    return %arg0, %arg1, %arg2 : i32, i32, i32
  }
  func.func @transform_2(%arg0: i32, %arg1: i32, %arg2: i32) -> (i32, i32, i32) {
    %c0_i32 = arith.constant 0 : i32
    return %arg0, %arg1, %arg2 : i32, i32, i32
  }
}

</mosaic_0001>

<bundles_post_ra>
// kernel: tpu_custom_call.1
= control target key start
LH: loop header
LB: loop body
LE: loop exit
PB: predicated region body
PF: predicated region fallthrough
CT: control target
= control target key end

     0   :  { %7 = vsyncpa [#allocation3], 0  ;;  %s720_s0 = inlined_call_operand.vmem [shape: f32[16,1], index: 0, kind: input, shape index: {}]   ;;  %s721_s1 = inlined_call_operand.hbm [shape: f32[2,16,128], index: 1, kind: input, shape index: {}]   ;;  %s722_s2 = inlined_call_operand.hbm [shape: f32[2,16,128], index: 2, kind: output, shape index: {}]  }
   0x1   :  { %9 = vsyncpa [#allocation3 + $0x1], 0 }
   0x2   :  { %10 = vsyncpa [#allocation4], 0 }
   0x3   :  { %12 = vsyncpa [#allocation4 + $0x1], 0  ;;  %s594_s9 = smov 0   ;;  %s596_s10 = smov 0  }
   0x4   :  { %s598_s11 = smov 0   ;;  %s600_s12 = smov 0  }
   0x5   :  { %s602_s13 = smov 0   ;;  %s604_s14 = smov 0  }
   0x6 LB: > { %s370_s15 = sadd.s32 4294967295, %s572_s14   ;;  %s371_s16 = sadd.s32 4294967294, %s572_s14   ;;  %s572_s14 = sphi %s604_s14, %s18_s14   ;;  %s568_s13 = sphi %s602_s13, %s731_s13   ;;  %s564_s12 = sphi %s600_s12, %s730_s12   ;;  %s560_s11 = sphi %s598_s11, %s729_s11   ;;  %s556_s10 = sphi %s596_s10, %s728_s10   ;;  %s552_s9 = sphi %s594_s9, %s727_s9  }
   0x7   : > { %s37_s17 = sadd.s32 1, %s568_s13  ;;  %s74_s18 = sadd.s32 1, %s560_s11 }
   0x8   : > { %p39_p0 = scmp.ge.s32.totalorder %s37_s17, 2  ;;  %p81_p1 = scmp.ne.s32.totalorder %s560_s11, %s556_s10 }
   0x9   : > { %p82_p2 = scmp.eq.s32.totalorder %s572_s14, 0  ;;  %p87_p3 = scmp.ne.s32.totalorder %s556_s10, %s552_s9 }
   0xa   : > { %s733_s17 = smov (%p39_p0, %s37_s17), 0  ;;  %p88_p5 = scmp.eq.s32.totalorder %s370_s15, 0 }
   0xb   : > { %p635_p4 = por %p82_p2, %p81_p1  ;;  %s67_s20 = ssub.s32 %s568_s13, %s733_s17 }
   0xc   : > { %p115_p6 = scmp.eq.s32.totalorder %s370_s15, 1  ;;  %p72_p7 = scmp.eq.s32.totalorder %s67_s20, 0 }
   0xd   : > { %p641_p8 = por %p88_p5, %p87_p3  ;;  %p121_p10 = scmp.eq.s32.totalorder %s371_s16, 1 }
   0xe   : > { %p645_p9 = por %p115_p6, %p81_p1  ;;  %p374_p12 = scmp.ge.s32.totalorder %s572_s14, 2 }
   0xf   : > { %s650_s23 = scalar_select %p72_p7, %s560_s11, %s74_s18  }
  0x10   : > { %p652_p11 = por %p121_p10, %p87_p3  ;;  %p400_p13 = scmp.lt.s32.totalorder %s572_s14, 2 }
  0x11   : > { %s150_s25 = sand.u32 1, %s560_s11   ;;  %s386_s27 = sshll.u32 %s568_s13, 4 }
  0x12   : > { %s375_s26 = sshll.u32 %s150_s25, 4  ;;  %s162_s30 = scalar_lea.hbm %s721_s1, %s386_s27 }
  0x13   : > { %s154_s3 = scalar_lea.vmem [#allocation2], %s375_s26  ;;  %s163_s5 = sshll.u32 %s162_s30, 4  ;;  %s164_s5 = int_to_ptr.hbm [resolvable:$true] %s163_s5 }
  0x14   : > { %s165_s4 = sshll.u32 %s154_s3, 4  ;;  %p393_p0 = pnand %p400_p13, %p635_p4  ;;  %s166_s4 = int_to_ptr.vmem [resolvable:$true] %s165_s4 }
  0x15   : > { %p378_p1 = scmp.ge.s32.totalorder %s572_s14, 1  ;;  %s151_s6 = scalar_lea.sflag [#allocation3], %s150_s25 }
  0x16   : > { %s574_s7 = smov 128   ;;  %s575_s8 = smov 8  }
  0x17   : > { %395 = dma.hbm_to_vmem [thread:$0]  (!%p393_p0), %s164_s5, 256, %s166_s4, %s151_s6, %s574_s7, %s574_s7, %s575_s8  }
  0x18   : > { %p173_p2 = scmp.lt.s32.totalorder %s572_s14, 3 }
  0x1a   : > { %p174_p3 = pnand %p378_p1, %p173_p2 }
  0x1b   : > { %s668_s15 = sand.u32 (!%p174_p3), 1, %s556_s10  }
  0x1c   : > { %177 = sbr.rel (%p174_p3) target bundleno = 177 (0xb1), region = 28  ;;  %s379_s16 = sshll.u32 (!%p174_p3), %s668_s15, 4 }
  0x1d   : > { %s180_s18 = scalar_lea.sflag (!%p174_p3), [#allocation3], %s668_s15  ;;  %s183_s20 = scalar_lea.vmem (!%p174_p3), [#allocation2], %s379_s16 }
  0x21   : > { %543 = dma.done.wait (%p641_p8), %s180_s18, 256  }
  0x22   : > { %545 = vsyncadd (%p641_p8), %s180_s18, 4294967040  ;;  %v576_v0 = vmov 0   ;;  %v218_v1 = vld [vmem:[%s720_s0] sm:$0xff]  ;;  %v219_v3 = vld [vmem:[%s720_s0 + $0x8] sm:$0xff]  ;;  %s387_s21 = sshll.u32 %s564_s12, 4  ;;  %s209_s3 = scalar_lea.vmem [#allocation5], %s379_s16 }
  0x23   : > { %455 = vset.pattern.permute.xlu0 %v576_v0  ;;  %v222_v2 = vmul.f32 0.5, %v218_v1  ;;  %v223_v4 = vmul.f32 0.5, %v219_v3  ;;  %v220_v5 = vld [vmem:[%s183_s20] sm:$0xff]  ;;  %v221_v8 = vld [vmem:[%s183_s20 + $0x8] sm:$0xff]  ;;  %s259_s30 = scalar_lea.hbm %s722_s2, %s387_s21  ;;  %s260_s4 = sshll.u32 %s209_s3, 4  ;;  %s261_s4 = int_to_ptr.vmem [resolvable:$true] %s260_s4 }
  0x24   : > { %s262_s5 = sshll.u32 %s259_s30, 4  ;;  %s245_s6 = scalar_lea.sflag [#allocation4], %s668_s15  ;;  %s263_s5 = int_to_ptr.hbm [resolvable:$true] %s262_s5 }
  0x25   : > { %226 = vperm.xlu0 %455, %v222_v2   ;;  %s504_s7 = sshra.s32 %s263_s5, 4  ;;  %s510_s16 = scalar_lea.hbm %s722_s2, 32  ;;  %s505_s7 = int_to_ptr.hbm [resolvable:$true] %s504_s7 }
  0x26   : > { %s506_s12 = scalar_lea.hbm %s505_s7, 16  ;;  %p511_p7 = scmp.lt.s32.totalorder %s505_s7, %s722_s2 }
  0x27   : > { %p507_p4 = scmp.ne.s32.totalorder %s505_s7, %s506_s12  ;;  %p512_p8 = scmp.lt.s32.totalorder %s510_s16, %s506_s12 }
  0x29   : > { %p508_p5 = pnand %p507_p4, %p645_p9  ;;  %p513_p10 = por %p512_p8, %p511_p7 }
  0x2b   : > { %p509_p6 = pneg %p508_p5 }
  0x2d   : > { %231 = vperm.xlu0 %455, %v223_v4   ;;  %p514_p13 = pnand %p513_p10, %p509_p6 }
  0x97   : > { %v227_v6 = vpop.permute.xlu0 %226 }
  0x98   : > { %v234_v7 = vmul.f32 %v227_v6, %v220_v5 }
  0x9a   : > { %456 = vtanh.f32 %v234_v7 }
  0x9f   : > { %v232_v9 = vpop.permute.xlu0 %231 }
  0xa0   : > { %v457_v10 = vpop.eup %456  ;;  %v235_v11 = vmul.f32 %v232_v9, %v221_v8 }
  0xa1   : > { %v238_v12 = vmul.f32 0.5, %v457_v10 }
  0xa2   : > { %458 = vtanh.f32 %v235_v11 }
  0xa3   : > { %v240_v13 = vadd.f32 0.5, %v238_v12 }
  0xa5   : > { %242 = vst [vmem:[%s209_s3] sm:$0xff] %v240_v13 }
  0xa8   : > { %v459_v14 = vpop.eup %458 }
  0xa9   : > { %v239_v15 = vmul.f32 0.5, %v459_v14 }
  0xab   : > { %v241_v16 = vadd.f32 0.5, %v239_v15 }
  0xad   : > { %243 = vst [vmem:[%s209_s3 + $0x8] sm:$0xff] %v241_v16 }
  0xae   : > { %517 = shalt.err (!%p514_p13)
}
  0xaf   : > { %s577_s15 = smov 128   ;;  %s578_s25 = smov 8  }
  0xb0   : > { %390 = dma.vmem_to_hbm [thread:$0]  (%p645_p9), %s261_s4, 256, %s263_s5, %s245_s6, %s577_s15, %s577_s15, %s578_s25  }
  0xb1 PF: > { %s277_s26 = sand.u32 1, %s552_s9   ;;  %p397_p0 = pnand %p374_p12, %p652_p11 }
  0xb2   : > { %s278_s27 = scalar_lea.sflag [#allocation4], %s277_s26 }
  0xb3   : > { %p398_p1 = pneg %p397_p0 }
  0xb5   : > { %547 = dma.done.wait (%p398_p1), %s278_s27, 256  }
  0xb6   : > { %549 = vsyncadd (%p398_p1), %s278_s27, 4294967040  ;;  %s18_s14 = sadd.s32 1, %s572_s14   ;;  %s727_s9 = smov %s556_s10 }
  0xb7   : > { %p15_p2 = scmp.ge.s32.totalorder %s18_s14, 4   ;;  %s728_s10 = smov %s560_s11 }
  0xb8   : > { %s729_s11 = smov %s650_s23  ;;  %s730_s12 = smov %s568_s13 }
  0xb9   : > { %s731_s13 = smov %s733_s17  ;;  %17 = sbr.rel (!%p15_p2) target bundleno = 6 (0x6), region = 76 }
  0xbe   :  { %284 = vsyncpa [#allocation3], 1 }
  0xbf   :  { %286 = vsyncpa [#allocation3 + $0x1], 1 }
  0xc0   :  { %287 = vsyncpa [#allocation4], 1 }
  0xc1   :  { %289 = vsyncpa [#allocation4 + $0x1], 1 }

</bundles_post_ra>
